<compile_context>
chip_gen: v7x
topology: tpu7x:2x2x1
jax: 0.10.0
libtpu: 0.0.40
codegen_flags: <defaults>
</compile_context>

<pallas_src>
import jax
import jax.numpy as jnp
from jax.experimental import pallas as pl
from jax.experimental.pallas import tpu as pltpu


def _round_up(x, m):
    return ((x + m - 1) // m) * m


def _pad2(a, rows, cols):
    pr, pc = rows - a.shape[0], cols - a.shape[1]
    if pr or pc:
        a = jnp.pad(a, ((0, pr), (0, pc)))
    return a


def _sigmoid(z):
    # Exact identity for sigmoid; keeps the transcendental on the EUP slot
    # (tanh) instead of a VALU divide.
    return 0.5 * jnp.tanh(0.5 * z) + 0.5


def _mlp_kernel(x_ref, w1_ref, b1_ref, w2_ref, b2_ref, o_ref):
    # Cast x to bf16 in vregs (no wrapper-side HBM copy), MXU matmul with f32 acc.
    x = x_ref[...].astype(jnp.bfloat16)
    h = jnp.dot(x, w1_ref[...], preferred_element_type=jnp.float32)
    h = _sigmoid(h + b1_ref[...])                      # f32 elementwise
    y = jnp.dot(h.astype(jnp.bfloat16), w2_ref[...],
                preferred_element_type=jnp.float32)
    o_ref[...] = _sigmoid(y + b2_ref[...]).astype(o_ref.dtype)


def _plan_tiles(B, in_size, hid_p, out_size, out_itemsize, block_b):
    """Pick the batch tile and a VMEM limit.

    - tile is a multiple of 8 (sublane constraint)
    - >= 2 grid tiles when possible so both v7x TensorCores get work
    - shrink the tile if the VMEM footprint (double-buffered x/out tiles,
      resident weights, f32 + bf16 hidden activation) exceeds a conservative
      budget that fits every chip's scoped default.
    """
    def need(tb, weight_bufs):
        weights = weight_bufs * (in_size * hid_p * 2 + hid_p * out_size * 2
                                 + hid_p * 4 + out_size * 4)
        x_tiles = 2 * tb * in_size * 4          # double-buffered f32 input tile
        o_tiles = 2 * tb * out_size * out_itemsize
        h_scratch = tb * hid_p * (4 + 2)        # f32 hidden act + its bf16 copy
        return weights + x_tiles + o_tiles + h_scratch

    tb = min(block_b, _round_up(B, 8))
    if B > 8:  # aim for at least 2 batch tiles (v7x has 2 TCs sharing the grid)
        tb = min(tb, _round_up(pl.cdiv(B, 2), 8))
    tb = max(8, (tb // 8) * 8)

    budget = 24 << 20  # conservative: fits the 32 MiB scoped default (v6e/v7x)
    while tb > 8 and need(tb, 2) > budget:
        tb = max(8, ((tb // 2) // 8) * 8)

    vmem_limit = int(min(max(2 * need(tb, 2), 32 << 20), 48 << 20))
    return tb, vmem_limit


def backprop_nn_forward(x, w1, b1, w2, b2, *, block_b=512, hid_align=128,
                        out_dtype=jnp.float32):
    """Pallas forward of BackPropagationNN: sigmoid(sigmoid(x@W1+b1)@W2+b2).

    x: (B, in), w1: (in, hidden), b1: (1, hidden), w2: (hidden, out), b2: (1, out).
    hid_align: lane alignment of the hidden dim (use 256 for large, MXU-bound
    layers on v6e/v7x; 128 is optimal on v5e and for small layers).
    """
    B, in_size = x.shape
    hidden = w1.shape[1]
    out_size = w2.shape[1]

    hid_p = _round_up(hidden, hid_align)
    tb, vmem_limit = _plan_tiles(B, in_size, hid_p, out_size,
                                 jnp.dtype(out_dtype).itemsize, block_b)
    b_p = _round_up(B, tb)

    # x stays f32 and feature-unpadded; only pad batch rows when needed.
    x_p = x if b_p == B else jnp.pad(x, ((0, b_p - B), (0, 0)))
    # Weight padding is exact: padded hidden lanes give sigmoid(0)=0.5, which
    # multiplies zero-padded w2 rows -> zero contribution to the output.
    w1_p = _pad2(w1, in_size, hid_p).astype(jnp.bfloat16)
    w2_p = _pad2(w2, hid_p, out_size).astype(jnp.bfloat16)
    b1_p = _pad2(b1, 1, hid_p).astype(jnp.float32)
    b2_p = b2.astype(jnp.float32)

    def build(single_buffer_weights):
        # Constant-index blocks never change across grid steps; single-buffer
        # them to halve the resident-weight VMEM footprint.
        res = ({"pipeline_mode": pl.Buffered(1)}
               if single_buffer_weights else {})
        return pl.pallas_call(
            _mlp_kernel,
            out_shape=jax.ShapeDtypeStruct((b_p, out_size), out_dtype),
            grid=(b_p // tb,),
            in_specs=[
                pl.BlockSpec((tb, in_size), lambda i: (i, 0)),           # x streamed
                pl.BlockSpec((in_size, hid_p), lambda i: (0, 0), **res),  # w1 resident
                pl.BlockSpec((1, hid_p), lambda i: (0, 0), **res),        # b1 resident
                pl.BlockSpec((hid_p, out_size), lambda i: (0, 0), **res),  # w2 resident
                pl.BlockSpec((1, out_size), lambda i: (0, 0), **res),      # b2 resident
            ],
            out_specs=pl.BlockSpec((tb, out_size), lambda i: (i, 0)),
            compiler_params=pltpu.CompilerParams(
                dimension_semantics=("parallel",),
                vmem_limit_bytes=vmem_limit),
        )

    args = (x_p, w1_p, b1_p, w2_p, b2_p)
    try:
        out_p = build(True)(*args)
    except Exception:
        # Fallback: default double-buffering if Buffered(1) is not supported
        # by this pallas_call lowering path.
        out_p = build(False)(*args)

    return out_p if b_p == B else out_p[:B]


def init_linear_params(key, fan_in, fan_out):
    """Deterministic init mimicking nn.Linear default: U(-1/sqrt(fan_in), +1/sqrt(fan_in)).

    Stored transposed relative to PyTorch's (out, in): here (in, out); bias is (1, out).
    """
    kw, kb = jax.random.split(key)
    bound = 1.0 / jnp.sqrt(fan_in)
    w = jax.random.uniform(kw, (fan_in, fan_out), jnp.float32, -bound, bound)
    b = jax.random.uniform(kb, (1, fan_out), jnp.float32, -bound, bound)
    return w, b


if __name__ == "__main__":
    input_size, hidden_size, output_size = 32, 64, 16
    batch = 8

    key = jax.random.PRNGKey(0)
    kx, k1, k2 = jax.random.split(key, 3)

    x = jax.random.normal(kx, (batch, input_size), jnp.float32)
    w1, b1 = init_linear_params(k1, input_size, hidden_size)
    w2, b2 = init_linear_params(k2, hidden_size, output_size)

    out = backprop_nn_forward(x, w1, b1, w2, b2)
    out = jax.block_until_ready(out)

    # Pure-JAX f32 reference of the forward semantics (kernel uses bf16 MXU
    # inputs, so allow a small absolute tolerance).
    h_ref = jax.nn.sigmoid(x @ w1 + b1)
    y_ref = jax.nn.sigmoid(h_ref @ w2 + b2)
    assert out.shape == (batch, output_size)
    assert jnp.allclose(out, y_ref, atol=2e-2, rtol=0.0), float(
        jnp.max(jnp.abs(out - y_ref)))

    print("KERNEL_OK")
</pallas_src>

<mosaic_0001>
module attributes {stable_mosaic.version = 11 : i64} {
  func.func @_mlp_kernel(%arg0: i32, %arg1: memref<8x32xf32, #tpu.memory_space<vmem>>, %arg2: memref<32x128xbf16, #tpu.memory_space<vmem>>, %arg3: memref<1x128xf32, #tpu.memory_space<vmem>>, %arg4: memref<128x16xbf16, #tpu.memory_space<vmem>>, %arg5: memref<1x16xf32, #tpu.memory_space<vmem>>, %arg6: memref<8x16xf32, #tpu.memory_space<vmem>>) attributes {dimension_semantics = [#tpu.dimension_semantics<parallel>], iteration_bounds = array<i64: 1>, scalar_prefetch = 0 : i64, scratch_operands = 0 : i64, tpu.core_type = #tpu.core_type<tc>, window_params = [{transform_indices = @transform_0, window_bounds = array<i64: 8, 32>}, {pipeline_mode = #tpu.pipeline_mode<synchronous>, transform_indices = @transform_1, window_bounds = array<i64: 32, 128>}, {pipeline_mode = #tpu.pipeline_mode<synchronous>, transform_indices = @transform_2, window_bounds = array<i64: 1, 128>}, {pipeline_mode = #tpu.pipeline_mode<synchronous>, transform_indices = @transform_3, window_bounds = array<i64: 128, 16>}, {pipeline_mode = #tpu.pipeline_mode<synchronous>, transform_indices = @transform_4, window_bounds = array<i64: 1, 16>}, {transform_indices = @transform_5, window_bounds = array<i64: 8, 16>}]} {
    %c0 = arith.constant 0 : index
    %c0_0 = arith.constant 0 : index
    %0 = vector.load %arg1[%c0, %c0_0] : memref<8x32xf32, #tpu.memory_space<vmem>>, vector<8x32xf32>
    %1 = arith.truncf %0 : vector<8x32xf32> to vector<8x32xbf16>
    %c0_1 = arith.constant 0 : index
    %c0_2 = arith.constant 0 : index
    %2 = vector.load %arg2[%c0_1, %c0_2] : memref<32x128xbf16, #tpu.memory_space<vmem>>, vector<32x128xbf16>
    %cst = arith.constant dense<0.000000e+00> : vector<8x128xf32>
    %3 = tpu.matmul %1, %2, %cst {dimension_numbers = #tpu.dot_dimension_numbers<[1], [0], [0], [1], [0, 0, 1, 1], [], []>} : vector<8x32xbf16>, vector<32x128xbf16>, vector<8x128xf32> -> vector<8x128xf32>
    %c0_3 = arith.constant 0 : index
    %c0_4 = arith.constant 0 : index
    %4 = vector.load %arg3[%c0_3, %c0_4] : memref<1x128xf32, #tpu.memory_space<vmem>>, vector<1x128xf32>
    %5 = vector.broadcast %4 : vector<1x128xf32> to vector<8x128xf32>
    %6 = arith.addf %3, %5 : vector<8x128xf32>
    %cst_5 = arith.constant 5.000000e-01 : f32
    %7 = vector.broadcast %cst_5 : f32 to vector<8x128xf32>
    %8 = arith.mulf %7, %6 : vector<8x128xf32>
    %9 = math.tanh %8 : vector<8x128xf32>
    %cst_6 = arith.constant 5.000000e-01 : f32
    %10 = vector.broadcast %cst_6 : f32 to vector<8x128xf32>
    %11 = arith.mulf %10, %9 : vector<8x128xf32>
    %cst_7 = arith.constant 5.000000e-01 : f32
    %12 = vector.broadcast %cst_7 : f32 to vector<8x128xf32>
    %13 = arith.addf %11, %12 : vector<8x128xf32>
    %14 = arith.truncf %13 : vector<8x128xf32> to vector<8x128xbf16>
    %c0_8 = arith.constant 0 : index
    %c0_9 = arith.constant 0 : index
    %15 = vector.load %arg4[%c0_8, %c0_9] : memref<128x16xbf16, #tpu.memory_space<vmem>>, vector<128x16xbf16>
    %cst_10 = arith.constant dense<0.000000e+00> : vector<8x16xf32>
    %16 = tpu.matmul %14, %15, %cst_10 {dimension_numbers = #tpu.dot_dimension_numbers<[1], [0], [0], [1], [0, 0, 1, 1], [], []>} : vector<8x128xbf16>, vector<128x16xbf16>, vector<8x16xf32> -> vector<8x16xf32>
    %c0_11 = arith.constant 0 : index
    %c0_12 = arith.constant 0 : index
    %17 = vector.load %arg5[%c0_11, %c0_12] : memref<1x16xf32, #tpu.memory_space<vmem>>, vector<1x16xf32>
    %18 = vector.broadcast %17 : vector<1x16xf32> to vector<8x16xf32>
    %19 = arith.addf %16, %18 : vector<8x16xf32>
    %cst_13 = arith.constant 5.000000e-01 : f32
    %20 = vector.broadcast %cst_13 : f32 to vector<8x16xf32>
    %21 = arith.mulf %20, %19 : vector<8x16xf32>
    %22 = math.tanh %21 : vector<8x16xf32>
    %cst_14 = arith.constant 5.000000e-01 : f32
    %23 = vector.broadcast %cst_14 : f32 to vector<8x16xf32>
    %24 = arith.mulf %23, %22 : vector<8x16xf32>
    %cst_15 = arith.constant 5.000000e-01 : f32
    %25 = vector.broadcast %cst_15 : f32 to vector<8x16xf32>
    %26 = arith.addf %24, %25 : vector<8x16xf32>
    %c0_16 = arith.constant 0 : index
    %c0_17 = arith.constant 0 : index
    %27 = vector.load %arg6[%c0_16, %c0_17] : memref<8x16xf32, #tpu.memory_space<vmem>>, vector<8x16xf32>
    tpu.vector_store %arg6[%c0_16, %c0_17], %26 {strides = array<i32>} : memref<8x16xf32, #tpu.memory_space<vmem>>, vector<8x16xf32>,
    return
  }
  func.func @transform_0(%arg0: i32) -> (i32, i32) {
    %c0_i32 = arith.constant 0 : i32
    %c0_i32_0 = arith.constant 0 : i32
    return %arg0, %c0_i32 : i32, i32
  }
  func.func @transform_1(%arg0: i32) -> (i32, i32) {
    %c0_i32 = arith.constant 0 : i32
    %c0_i32_0 = arith.constant 0 : i32
    %c0_i32_1 = arith.constant 0 : i32
    return %c0_i32, %c0_i32_0 : i32, i32
  }
  func.func @transform_2(%arg0: i32) -> (i32, i32) {
    %c0_i32 = arith.constant 0 : i32
    %c0_i32_0 = arith.constant 0 : i32
    %c0_i32_1 = arith.constant 0 : i32
    return %c0_i32, %c0_i32_0 : i32, i32
  }
  func.func @transform_3(%arg0: i32) -> (i32, i32) {
    %c0_i32 = arith.constant 0 : i32
    %c0_i32_0 = arith.constant 0 : i32
    %c0_i32_1 = arith.constant 0 : i32
    return %c0_i32, %c0_i32_0 : i32, i32
  }
  func.func @transform_4(%arg0: i32) -> (i32, i32) {
    %c0_i32 = arith.constant 0 : i32
    %c0_i32_0 = arith.constant 0 : i32
    %c0_i32_1 = arith.constant 0 : i32
    return %c0_i32, %c0_i32_0 : i32, i32
  }
  func.func @transform_5(%arg0: i32) -> (i32, i32) {
    %c0_i32 = arith.constant 0 : i32
    %c0_i32_0 = arith.constant 0 : i32
    return %arg0, %c0_i32 : i32, i32
  }
}

module attributes {stable_mosaic.version = 11 : i64} {
  func.func @_mlp_kernel(%arg0: i32, %arg1: memref<8x32xf32, #tpu.memory_space<vmem>>, %arg2: memref<32x128xbf16, #tpu.memory_space<vmem>>, %arg3: memref<1x128xf32, #tpu.memory_space<vmem>>, %arg4: memref<128x16xbf16, #tpu.memory_space<vmem>>, %arg5: memref<1x16xf32, #tpu.memory_space<vmem>>, %arg6: memref<8x16xf32, #tpu.memory_space<vmem>>) attributes {dimension_semantics = [#tpu.dimension_semantics<parallel>], iteration_bounds = array<i64: 1>, scalar_prefetch = 0 : i64, scratch_operands = 0 : i64, tpu.core_type = #tpu.core_type<tc>, window_params = [{transform_indices = @transform_0, window_bounds = array<i64: 8, 32>}, {pipeline_mode = #tpu.pipeline_mode<synchronous>, transform_indices = @transform_1, window_bounds = array<i64: 32, 128>}, {pipeline_mode = #tpu.pipeline_mode<synchronous>, transform_indices = @transform_2, window_bounds = array<i64: 1, 128>}, {pipeline_mode = #tpu.pipeline_mode<synchronous>, transform_indices = @transform_3, window_bounds = array<i64: 128, 16>}, {pipeline_mode = #tpu.pipeline_mode<synchronous>, transform_indices = @transform_4, window_bounds = array<i64: 1, 16>}, {transform_indices = @transform_5, window_bounds = array<i64: 8, 16>}]} {
    %c0 = arith.constant 0 : index
    %c0_0 = arith.constant 0 : index
    %0 = vector.load %arg1[%c0, %c0_0] : memref<8x32xf32, #tpu.memory_space<vmem>>, vector<8x32xf32>
    %1 = arith.truncf %0 : vector<8x32xf32> to vector<8x32xbf16>
    %c0_1 = arith.constant 0 : index
    %c0_2 = arith.constant 0 : index
    %2 = vector.load %arg2[%c0_1, %c0_2] : memref<32x128xbf16, #tpu.memory_space<vmem>>, vector<32x128xbf16>
    %cst = arith.constant dense<0.000000e+00> : vector<8x128xf32>
    %3 = tpu.matmul %1, %2, %cst {dimension_numbers = #tpu.dot_dimension_numbers<[1], [0], [0], [1], [0, 0, 1, 1], [], []>} : vector<8x32xbf16>, vector<32x128xbf16>, vector<8x128xf32> -> vector<8x128xf32>
    %c0_3 = arith.constant 0 : index
    %c0_4 = arith.constant 0 : index
    %4 = vector.load %arg3[%c0_3, %c0_4] : memref<1x128xf32, #tpu.memory_space<vmem>>, vector<1x128xf32>
    %5 = vector.broadcast %4 : vector<1x128xf32> to vector<8x128xf32>
    %6 = arith.addf %3, %5 : vector<8x128xf32>
    %cst_5 = arith.constant 5.000000e-01 : f32
    %7 = vector.broadcast %cst_5 : f32 to vector<8x128xf32>
    %8 = arith.mulf %7, %6 : vector<8x128xf32>
    %9 = math.tanh %8 : vector<8x128xf32>
    %cst_6 = arith.constant 5.000000e-01 : f32
    %10 = vector.broadcast %cst_6 : f32 to vector<8x128xf32>
    %11 = arith.mulf %10, %9 : vector<8x128xf32>
    %cst_7 = arith.constant 5.000000e-01 : f32
    %12 = vector.broadcast %cst_7 : f32 to vector<8x128xf32>
    %13 = arith.addf %11, %12 : vector<8x128xf32>
    %14 = arith.truncf %13 : vector<8x128xf32> to vector<8x128xbf16>
    %c0_8 = arith.constant 0 : index
    %c0_9 = arith.constant 0 : index
    %15 = vector.load %arg4[%c0_8, %c0_9] : memref<128x16xbf16, #tpu.memory_space<vmem>>, vector<128x16xbf16>
    %cst_10 = arith.constant dense<0.000000e+00> : vector<8x16xf32>
    %16 = tpu.matmul %14, %15, %cst_10 {dimension_numbers = #tpu.dot_dimension_numbers<[1], [0], [0], [1], [0, 0, 1, 1], [], []>} : vector<8x128xbf16>, vector<128x16xbf16>, vector<8x16xf32> -> vector<8x16xf32>
    %c0_11 = arith.constant 0 : index
    %c0_12 = arith.constant 0 : index
    %17 = vector.load %arg5[%c0_11, %c0_12] : memref<1x16xf32, #tpu.memory_space<vmem>>, vector<1x16xf32>
    %18 = vector.broadcast %17 : vector<1x16xf32> to vector<8x16xf32>
    %19 = arith.addf %16, %18 : vector<8x16xf32>
    %cst_13 = arith.constant 5.000000e-01 : f32
    %20 = vector.broadcast %cst_13 : f32 to vector<8x16xf32>
    %21 = arith.mulf %20, %19 : vector<8x16xf32>
    %22 = math.tanh %21 : vector<8x16xf32>
    %cst_14 = arith.constant 5.000000e-01 : f32
    %23 = vector.broadcast %cst_14 : f32 to vector<8x16xf32>
    %24 = arith.mulf %23, %22 : vector<8x16xf32>
    %cst_15 = arith.constant 5.000000e-01 : f32
    %25 = vector.broadcast %cst_15 : f32 to vector<8x16xf32>
    %26 = arith.addf %24, %25 : vector<8x16xf32>
    %c0_16 = arith.constant 0 : index
    %c0_17 = arith.constant 0 : index
    %27 = vector.load %arg6[%c0_16, %c0_17] : memref<8x16xf32, #tpu.memory_space<vmem>>, vector<8x16xf32>
    tpu.vector_store %arg6[%c0_16, %c0_17], %26 {strides = array<i32>} : memref<8x16xf32, #tpu.memory_space<vmem>>, vector<8x16xf32>,
    return
  }
  func.func @transform_0(%arg0: i32) -> (i32, i32) {
    %c0_i32 = arith.constant 0 : i32
    %c0_i32_0 = arith.constant 0 : i32
    return %arg0, %c0_i32 : i32, i32
  }
  func.func @transform_1(%arg0: i32) -> (i32, i32) {
    %c0_i32 = arith.constant 0 : i32
    %c0_i32_0 = arith.constant 0 : i32
    %c0_i32_1 = arith.constant 0 : i32
    return %c0_i32, %c0_i32_0 : i32, i32
  }
  func.func @transform_2(%arg0: i32) -> (i32, i32) {
    %c0_i32 = arith.constant 0 : i32
    %c0_i32_0 = arith.constant 0 : i32
    %c0_i32_1 = arith.constant 0 : i32
    return %c0_i32, %c0_i32_0 : i32, i32
  }
  func.func @transform_3(%arg0: i32) -> (i32, i32) {
    %c0_i32 = arith.constant 0 : i32
    %c0_i32_0 = arith.constant 0 : i32
    %c0_i32_1 = arith.constant 0 : i32
    return %c0_i32, %c0_i32_0 : i32, i32
  }
  func.func @transform_4(%arg0: i32) -> (i32, i32) {
    %c0_i32 = arith.constant 0 : i32
    %c0_i32_0 = arith.constant 0 : i32
    %c0_i32_1 = arith.constant 0 : i32
    return %c0_i32, %c0_i32_0 : i32, i32
  }
  func.func @transform_5(%arg0: i32) -> (i32, i32) {
    %c0_i32 = arith.constant 0 : i32
    %c0_i32_0 = arith.constant 0 : i32
    return %arg0, %c0_i32 : i32, i32
  }
}

</mosaic_0001>

<bundles_post_ra>
// kernel: tpu_custom_call.1
= control target key start
LH: loop header
LB: loop body
LE: loop exit
PB: predicated region body
PF: predicated region fallthrough
CT: control target
= control target key end

     0   :  { %v321_v1 = vmov 0.0   ;;  %vm322_vm0 = vmmov 0   ;;  %vm47_vm1 = vcmask 261120   ;;  %s405_s0 = inlined_call_operand.vmem [shape: f32[8,32], index: 0, kind: input, shape index: {}]   ;;  %s406_s1 = inlined_call_operand.vmem [shape: bf16[32,128], index: 1, kind: input, shape index: {}]   ;;  %s407_s2 = inlined_call_operand.vmem [shape: f32[1,128], index: 2, kind: input, shape index: {}]   ;;  %s408_s3 = inlined_call_operand.vmem [shape: bf16[128,16], index: 3, kind: input, shape index: {}]   ;;  %s409_s4 = inlined_call_operand.vmem [shape: f32[1,16], index: 4, kind: input, shape index: {}]   ;;  %s410_s5 = inlined_call_operand.hbm [shape: f32[8,16], index: 5, kind: output, shape index: {}]  }
   0x1   :  { %v283_v0 = vld [vmem:[%s406_s1] sm:$0xff]   ;;  %252 = vmatprep.subr.bf16.mxu0 %v321_v1  ;;  %v284_v2 = vld [vmem:[%s406_s1 + $0x8] sm:$0xff]   ;;  %260 = vmatprep.subr.bf16.mxu1 %v321_v1  ;;  %v287_v7 = vld [vmem:[%s408_s3 + $0x10] sm:$0xff]  }
   0x2   :  { %253 = vmatpush3.bf16.msra.mxu0 %v283_v0  ;;  %256 = vmatprep.mubr.msk.bf16.mxu0 %vm322_vm0, %v321_v1  ;;  %v22_v3 = vld [vmem:[%s405_s0] sm:$0xff]  ;;  %v286_v6 = vld [vmem:[%s408_s3 + $0x8] sm:$0xff]  }
   0x3   :  { %254 = vmatprep.subr.bf16.mxu0 %v321_v1  ;;  %v285_v4 = vld [vmem:[%s408_s3] sm:$0xff]   ;;  %276 = vmatprep.mubr.msk.bf16.mxu1 %vm322_vm0, %v321_v1  ;;  %v23_v5 = vpack.c.bf16 %v22_v3, %v22_v3 }
   0x4   :  { %261 = vmatpush3.bf16.msra.mxu1 %v285_v4 }
   0x5   :  { %262 = vmatprep.subr.bf16.mxu1 %v321_v1 }
   0x6   :  { %255 = vmatpush3.bf16.msra.mxu0 %v284_v2 }
   0x8   :  { %263 = vmatpush3.bf16.msra.mxu1 %v286_v6 }
   0x9   :  { %257 = vmatmul.mubr.msk.bf16.vlgmr.msra.gmra.mrb[0].mxu0 %vm47_vm1, %v23_v5 }
   0xa   :  { %10 = vsyncpa [#allocation3], 0  ;;  %264 = vmatprep.subr.bf16.mxu1 %v321_v1  ;;  %v288_v8 = vld [vmem:[%s408_s3 + $0x18] sm:$0xff]   ;;  %v289_v9 = vld [vmem:[%s408_s3 + $0x20] sm:$0xff]   ;;  %vm211_vm2 = vcmask 130048  }
   0xb   :  { %v290_v10 = vld [vmem:[%s408_s3 + $0x28] sm:$0xff]   ;;  %v291_v11 = vld [vmem:[%s408_s3 + $0x30] sm:$0xff]   ;;  %v292_v12 = vld [vmem:[%s408_s3 + $0x38] sm:$0xff]  }
   0xc   :  { %265 = vmatpush3.bf16.msra.mxu1 %v287_v7  ;;  %v227_v13 = vld [vmem:[%s407_s2] ss:$0 sm:$0xff]  ;;  %s323_s2 = smov [#allocation2]  }
   0xd   :  { %266 = vmatprep.subr.bf16.mxu1 %v321_v1  ;;  %v231_v24 = vld [vmem:[%s409_s4] ss:$0 sm:$0xff]  ;;  %s219_s3 = sshll.u32 %s323_s2, 4  ;;  %s220_s3 = int_to_ptr.vmem [resolvable:$true] %s219_s3 }
   0xe   :  { %s297_s17 = scalar_lea.vmem %s220_s3, 128  ;;  %p302_p1 = scmp.lt.s32.totalorder %s220_s3, %s220_s3 }
   0xf   :  { %p298_p0 = scmp.ne.s32.totalorder %s220_s3, %s297_s17  ;;  %p303_p2 = scmp.lt.s32.totalorder %s297_s17, %s297_s17 }
  0x10   :  { %267 = vmatpush3.bf16.msra.mxu1 %v288_v8 }
  0x11   :  { %268 = vmatprep.subr.bf16.mxu1 %v321_v1  ;;  %p304_p3 = por %p303_p2, %p302_p1 }
  0x13   :  { %p305_p4 = pnand %p304_p3, %p298_p0 }
  0x14   :  { %269 = vmatpush3.bf16.msra.mxu1 %v289_v9 }
  0x15   :  { %270 = vmatprep.subr.bf16.mxu1 %v321_v1 }
  0x18   :  { %271 = vmatpush3.bf16.msra.mxu1 %v290_v10 }
  0x19   :  { %272 = vmatprep.subr.bf16.mxu1 %v321_v1 }
  0x1c   :  { %273 = vmatpush3.bf16.msra.mxu1 %v291_v11 }
  0x1d   :  { %274 = vmatprep.subr.bf16.mxu1 %v321_v1 }
  0x20   :  { %275 = vmatpush3.bf16.msra.mxu1 %v292_v12 }
  0xdc   :  { %v85_v14 = vpop.f32.mrb[0].mxu0 }
  0xdd   :  { %v86_v15 = vadd.f32 %v227_v13, %v85_v14  ;;  %v258_v16 = vpop.f32.mrb[1].mxu0 }
  0xde   :  { %v88_v17 = vpop.f32.mrb[2].mxu0 }
  0xdf   :  { %v91_v18 = vmul.f32 0.5, %v86_v15  ;;  %v259_v19 = vpop.f32.mrb[3].mxu0 }
  0xe1   :  { %293 = vtanh.f32 %v91_v18 }
  0xeb   :  { %v294_v20 = vpop.eup %293 }
  0xec   :  { %v93_v21 = vmul.f32 0.5, %v294_v20 }
  0xee   :  { %v94_v22 = vadd.f32 0.5, %v93_v21 }
  0xf0   :  { %v95_v23 = vpack.c.bf16 %v94_v22, %v94_v22 }
  0xf2   :  { %277 = vmatmul.mubr.bf16.vlgmr.msra.gmra.mrb[0].mxu1 %v95_v23 }
 0x1c5   :  { %v201_v25 = vpop.f32.mrb[0].mxu1 }
 0x1c6   :  { %v202_v26 = vadd.f32 %v231_v24, %v201_v25  ;;  %v278_v27 = vpop.f32.mrb[1].mxu1 }
 0x1c7   :  { %v204_v28 = vpop.f32.mrb[2].mxu1 }
 0x1c8   :  { %v207_v29 = vmul.f32 0.5, %v202_v26  ;;  %v279_v30 = vpop.f32.mrb[3].mxu1 }
 0x1ca   :  { %295 = vtanh.f32 %v207_v29 }
 0x1d4   :  { %v296_v31 = vpop.eup %295 }
 0x1d5   :  { %v209_v32 = vmul.f32 0.5, %v296_v31 }
 0x1d7   :  { %v210_v33 = vadd.f32 0.5, %v209_v32 }
 0x1d9   :  { %212 = vst.msk [vmem:[#allocation2] sm:$0xff] %vm211_vm2, %v210_v33 }
 0x1da   :  { %308 = shalt.err (!%p305_p4)
}
 0x1db   :  { %s309_s19 = scalar_lea.hbm %s410_s5, 128 }
 0x1dc   :  { %p310_p5 = scmp.ne.s32.totalorder %s410_s5, %s309_s19  ;;  %p313_p6 = scmp.lt.u32.totalorder %s309_s19, %s410_s5 }
 0x1de   :  { %p315_p7 = pnand %p313_p6, %p310_p5 }
 0x1e0   :  { %318 = shalt.err (!%p315_p7)
}
 0x1e1   :  { %222 = dma.vmem_to_hbm [thread:$0]  %s220_s3, 128, %s410_s5, [#allocation3]  }
 0x1e2   :  { %319 = dma.done.wait [#allocation3], 128  }
 0x1e3   :  { %320 = vsyncadd [#allocation3], 4294967168 }
 0x1e4   :  { %226 = vsyncpa [#allocation3], 1 }

// kernel: tpu_custom_call.1
= control target key start
LH: loop header
LB: loop body
LE: loop exit
PB: predicated region body
PF: predicated region fallthrough
CT: control target
= control target key end

     0   :  { %v321_v1 = vmov 0.0   ;;  %vm322_vm0 = vmmov 0   ;;  %vm47_vm1 = vcmask 261120   ;;  %s405_s0 = inlined_call_operand.vmem [shape: f32[8,32], index: 0, kind: input, shape index: {}]   ;;  %s406_s1 = inlined_call_operand.vmem [shape: bf16[32,128], index: 1, kind: input, shape index: {}]   ;;  %s407_s2 = inlined_call_operand.vmem [shape: f32[1,128], index: 2, kind: input, shape index: {}]   ;;  %s408_s3 = inlined_call_operand.vmem [shape: bf16[128,16], index: 3, kind: input, shape index: {}]   ;;  %s409_s4 = inlined_call_operand.vmem [shape: f32[1,16], index: 4, kind: input, shape index: {}]   ;;  %s410_s5 = inlined_call_operand.hbm [shape: f32[8,16], index: 5, kind: output, shape index: {}]  }
   0x1   :  { %v283_v0 = vld [vmem:[%s406_s1] sm:$0xff]   ;;  %252 = vmatprep.subr.bf16.mxu0 %v321_v1  ;;  %v284_v2 = vld [vmem:[%s406_s1 + $0x8] sm:$0xff]   ;;  %260 = vmatprep.subr.bf16.mxu1 %v321_v1  ;;  %v287_v7 = vld [vmem:[%s408_s3 + $0x10] sm:$0xff]  }
   0x2   :  { %253 = vmatpush3.bf16.msra.mxu0 %v283_v0  ;;  %256 = vmatprep.mubr.msk.bf16.mxu0 %vm322_vm0, %v321_v1  ;;  %v22_v3 = vld [vmem:[%s405_s0] sm:$0xff]  ;;  %v286_v6 = vld [vmem:[%s408_s3 + $0x8] sm:$0xff]  }
   0x3   :  { %254 = vmatprep.subr.bf16.mxu0 %v321_v1  ;;  %v285_v4 = vld [vmem:[%s408_s3] sm:$0xff]   ;;  %276 = vmatprep.mubr.msk.bf16.mxu1 %vm322_vm0, %v321_v1  ;;  %v23_v5 = vpack.c.bf16 %v22_v3, %v22_v3 }
   0x4   :  { %261 = vmatpush3.bf16.msra.mxu1 %v285_v4 }
   0x5   :  { %262 = vmatprep.subr.bf16.mxu1 %v321_v1 }
   0x6   :  { %255 = vmatpush3.bf16.msra.mxu0 %v284_v2 }
   0x8   :  { %263 = vmatpush3.bf16.msra.mxu1 %v286_v6 }
   0x9   :  { %257 = vmatmul.mubr.msk.bf16.vlgmr.msra.gmra.mrb[0].mxu0 %vm47_vm1, %v23_v5 }
   0xa   :  { %10 = vsyncpa [#allocation3], 0  ;;  %264 = vmatprep.subr.bf16.mxu1 %v321_v1  ;;  %v288_v8 = vld [vmem:[%s408_s3 + $0x18] sm:$0xff]   ;;  %v289_v9 = vld [vmem:[%s408_s3 + $0x20] sm:$0xff]   ;;  %vm211_vm2 = vcmask 130048  }
   0xb   :  { %v290_v10 = vld [vmem:[%s408_s3 + $0x28] sm:$0xff]   ;;  %v291_v11 = vld [vmem:[%s408_s3 + $0x30] sm:$0xff]   ;;  %v292_v12 = vld [vmem:[%s408_s3 + $0x38] sm:$0xff]  }
   0xc   :  { %265 = vmatpush3.bf16.msra.mxu1 %v287_v7  ;;  %v227_v13 = vld [vmem:[%s407_s2] ss:$0 sm:$0xff]  ;;  %s323_s2 = smov [#allocation2]  }
   0xd   :  { %266 = vmatprep.subr.bf16.mxu1 %v321_v1  ;;  %v231_v24 = vld [vmem:[%s409_s4] ss:$0 sm:$0xff]  ;;  %s219_s3 = sshll.u32 %s323_s2, 4  ;;  %s220_s3 = int_to_ptr.vmem [resolvable:$true] %s219_s3 }
   0xe   :  { %s297_s17 = scalar_lea.vmem %s220_s3, 128  ;;  %p302_p1 = scmp.lt.s32.totalorder %s220_s3, %s220_s3 }
   0xf   :  { %p298_p0 = scmp.ne.s32.totalorder %s220_s3, %s297_s17  ;;  %p303_p2 = scmp.lt.s32.totalorder %s297_s17, %s297_s17 }
  0x10   :  { %267 = vmatpush3.bf16.msra.mxu1 %v288_v8 }
  0x11   :  { %268 = vmatprep.subr.bf16.mxu1 %v321_v1  ;;  %p304_p3 = por %p303_p2, %p302_p1 }
  0x13   :  { %p305_p4 = pnand %p304_p3, %p298_p0 }
  0x14   :  { %269 = vmatpush3.bf16.msra.mxu1 %v289_v9 }
  0x15   :  { %270 = vmatprep.subr.bf16.mxu1 %v321_v1 }
  0x18   :  { %271 = vmatpush3.bf16.msra.mxu1 %v290_v10 }
  0x19   :  { %272 = vmatprep.subr.bf16.mxu1 %v321_v1 }
  0x1c   :  { %273 = vmatpush3.bf16.msra.mxu1 %v291_v11 }
  0x1d   :  { %274 = vmatprep.subr.bf16.mxu1 %v321_v1 }
  0x20   :  { %275 = vmatpush3.bf16.msra.mxu1 %v292_v12 }
  0xdc   :  { %v85_v14 = vpop.f32.mrb[0].mxu0 }
  0xdd   :  { %v86_v15 = vadd.f32 %v227_v13, %v85_v14  ;;  %v258_v16 = vpop.f32.mrb[1].mxu0 }
  0xde   :  { %v88_v17 = vpop.f32.mrb[2].mxu0 }
  0xdf   :  { %v91_v18 = vmul.f32 0.5, %v86_v15  ;;  %v259_v19 = vpop.f32.mrb[3].mxu0 }
  0xe1   :  { %293 = vtanh.f32 %v91_v18 }
  0xeb   :  { %v294_v20 = vpop.eup %293 }
  0xec   :  { %v93_v21 = vmul.f32 0.5, %v294_v20 }
  0xee   :  { %v94_v22 = vadd.f32 0.5, %v93_v21 }
  0xf0   :  { %v95_v23 = vpack.c.bf16 %v94_v22, %v94_v22 }
  0xf2   :  { %277 = vmatmul.mubr.bf16.vlgmr.msra.gmra.mrb[0].mxu1 %v95_v23 }
 0x1c5   :  { %v201_v25 = vpop.f32.mrb[0].mxu1 }
 0x1c6   :  { %v202_v26 = vadd.f32 %v231_v24, %v201_v25  ;;  %v278_v27 = vpop.f32.mrb[1].mxu1 }
 0x1c7   :  { %v204_v28 = vpop.f32.mrb[2].mxu1 }
 0x1c8   :  { %v207_v29 = vmul.f32 0.5, %v202_v26  ;;  %v279_v30 = vpop.f32.mrb[3].mxu1 }
 0x1ca   :  { %295 = vtanh.f32 %v207_v29 }
 0x1d4   :  { %v296_v31 = vpop.eup %295 }
 0x1d5   :  { %v209_v32 = vmul.f32 0.5, %v296_v31 }
 0x1d7   :  { %v210_v33 = vadd.f32 0.5, %v209_v32 }
 0x1d9   :  { %212 = vst.msk [vmem:[#allocation2] sm:$0xff] %vm211_vm2, %v210_v33 }
 0x1da   :  { %308 = shalt.err (!%p305_p4)
}
 0x1db   :  { %s309_s19 = scalar_lea.hbm %s410_s5, 128 }
 0x1dc   :  { %p310_p5 = scmp.ne.s32.totalorder %s410_s5, %s309_s19  ;;  %p313_p6 = scmp.lt.u32.totalorder %s309_s19, %s410_s5 }
 0x1de   :  { %p315_p7 = pnand %p313_p6, %p310_p5 }
 0x1e0   :  { %318 = shalt.err (!%p315_p7)
}
 0x1e1   :  { %222 = dma.vmem_to_hbm [thread:$0]  %s220_s3, 128, %s410_s5, [#allocation3]  }
 0x1e2   :  { %319 = dma.done.wait [#allocation3], 128  }
 0x1e3   :  { %320 = vsyncadd [#allocation3], 4294967168 }
 0x1e4   :  { %226 = vsyncpa [#allocation3], 1 }

</bundles_post_ra>
